<compile_context>
chip_gen: v7x
topology: tpu7x:2x2x1
jax: 0.10.0
libtpu: 0.0.40
codegen_flags: <defaults>
</compile_context>

<pallas_src>
import functools

import numpy as np
import jax
import jax.numpy as jnp
from jax.experimental import pallas as pl
from jax.experimental.pallas import tpu as pltpu


# ----------------------------------------------------------------------------
# Synthetic deterministic stand-ins for the repo-level helpers.
# ----------------------------------------------------------------------------
v_num_dict = {0: 12, 1: 42, 2: 162, 3: 642}  # icosahedral sphere vertex counts


def gen_indexes(graph_level, mode, kernel_size, key):
    """Deterministic synthetic version of spasgcn's gen_indexes.

    Returns:
      index:   int32 (V, N)  neighbor indices per vertex (N == kernel_size)
      itp_mat: f32   (V, N, K) interpolation matrix
    """
    del mode
    V = v_num_dict[graph_level]
    N = kernel_size
    base = np.arange(V, dtype=np.int32)
    index = (base[:, None] + np.arange(N, dtype=np.int32)[None, :] * 3) % V
    index[:, 0] = base  # center vertex first
    itp = jax.random.uniform(key, (V, N, kernel_size), dtype=jnp.float32, minval=0.1)
    itp = itp / jnp.sum(itp, axis=1, keepdims=True)  # row-normalized interpolation weights
    return index, itp


# ----------------------------------------------------------------------------
# Pallas kernel: interpolation (VPU, lane-dense on V) + fused (1,K) conv (one MXU matmul).
# ----------------------------------------------------------------------------
def _sphere_conv_kernel(g_ref, itp_ref, w_ref, b_ref, o_ref, *,
                        batch_tile, c_in, k_pad, n_taps):
    # g_ref:   (TB, C_in, N, V)       gathered neighbor features, V on lanes
    # itp_ref: (Kp, N, V)             interpolation weights, transposed + K zero-padded
    # w_ref:   (C_out, C_in * Kp)     conv weights flattened (c-major, k-minor), zero-padded
    # b_ref:   (C_out, 1)             conv bias
    # o_ref:   (TB, C_out, V)         output, V on lanes (lane-dense stores)
    itp = itp_ref[...]                        # (Kp, N, V)  f32
    w = w_ref[...]                            # (C_out, C_in*Kp)
    bias = b_ref[...]                         # (C_out, 1)
    v = itp.shape[-1]

    for b in range(batch_tile):               # static, small batch-tile loop
        g = g_ref[b]                          # (C_in, N, V)
        # Interpolation: z[c, k, v] = sum_n g[c, n, v] * itp[k, n, v]
        # Lane-dense VPU multiply-accumulate over the (small) neighbor axis N.
        z = jnp.zeros((c_in, k_pad, v), jnp.float32)
        for n in range(n_taps):
            z = z + g[:, n, :][:, None, :] * itp[:, n, :][None, :, :]
        # Fused (1,K) conv over ALL input channels: one MXU matmul.
        # (C_in, Kp, V) -> (C_in*Kp, V) is a sublane-aligned collapse (Kp % 8 == 0).
        z2 = z.reshape(c_in * k_pad, v)
        out = jnp.dot(w, z2, preferred_element_type=jnp.float32) + bias   # (C_out, V)
        o_ref[b] = out.astype(o_ref.dtype)


def sphere_conv_forward(x, index, sel, itp_mat, conv_w, conv_b, *, batch_tile=1):
    """Forward pass of SelectTrainSphereConv (training mode, default select).

    x:       (B, C_in, V) float32
    index:   (V, N) int
    sel:     (Vs,) selected vertex indices (== arange(V) for default config)
    itp_mat: (V, N, K) float32
    conv_w:  (C_out, C_in, 1, K) float32
    conv_b:  (C_out,) float32
    returns  (B, C_out, Vs) float32
    """
    B, C_in, V = x.shape
    C_out = conv_w.shape[0]
    K = conv_w.shape[-1]
    N = index.shape[1]

    # --- XLA glue: neighbor gather straight into the lane-dense (B, C_in, N, V) layout.
    idx_sel = jnp.asarray(index)[jnp.asarray(sel)]        # (Vs, N)
    idx_t = idx_sel.T                                     # (N, Vs)
    G = x[:, :, idx_t]                                    # (B, C_in, N, Vs)
    Vs = G.shape[3]
    assert Vs == V, "default config: select is identity, itp_mat broadcast requires Vs == V"
    assert B % batch_tile == 0

    # --- Weight / interpolation prep (lane-dense on V, K zero-padded to a multiple of 8
    #     so the in-kernel flatten (C_in, Kp, V) -> (C_in*Kp, V) is layout-aligned).
    K_pad = ((K + 7) // 8) * 8
    itp_t = jnp.transpose(itp_mat, (2, 1, 0))             # (K, N, V)
    itp_t = jnp.pad(itp_t, ((0, K_pad - K), (0, 0), (0, 0)))          # (Kp, N, V)
    w_k = conv_w[:, :, 0, :]                              # (C_out, C_in, K)
    w_k = jnp.pad(w_k, ((0, 0), (0, 0), (0, K_pad - K)))  # (C_out, C_in, Kp)
    w2 = w_k.reshape(C_out, C_in * K_pad)                 # (C_out, C_in*Kp), c-major/k-minor
    b2 = conv_b[:, None]                                  # (C_out, 1)

    TB = batch_tile
    kernel = functools.partial(_sphere_conv_kernel, batch_tile=TB, c_in=C_in,
                               k_pad=K_pad, n_taps=N)

    out = pl.pallas_call(
        kernel,
        out_shape=jax.ShapeDtypeStruct((B, C_out, Vs), jnp.float32),
        grid_spec=pltpu.PrefetchScalarGridSpec(
            num_scalar_prefetch=0,
            grid=(B // TB,),   # >=2 parallel steps for B=2, TB=1 (keeps both v7x TCs busy)
            in_specs=[
                pl.BlockSpec((TB, C_in, N, Vs), lambda i: (i, 0, 0, 0)),
                pl.BlockSpec((K_pad, N, Vs), lambda i: (0, 0, 0)),
                pl.BlockSpec((C_out, C_in * K_pad), lambda i: (0, 0)),
                pl.BlockSpec((C_out, 1), lambda i: (0, 0)),
            ],
            out_specs=pl.BlockSpec((TB, C_out, Vs), lambda i: (i, 0, 0)),
        ),
        compiler_params=pltpu.CompilerParams(dimension_semantics=("parallel",)),
    )(G, itp_t, w2, b2)

    return out                                            # (B, C_out, Vs) — no transpose needed


# ----------------------------------------------------------------------------
# Pure-JAX reference, mirroring the PyTorch forward op-for-op.
# ----------------------------------------------------------------------------
def reference_forward(x, index, sel, itp_mat, conv_w, conv_b):
    t = jnp.transpose(x, (2, 0, 1))            # (V, B, C)
    t = t[index]                               # (V, N, B, C)
    t = t[sel]                                 # (Vs, N, B, C)
    t = jnp.transpose(t, (2, 3, 0, 1))         # (B, C, Vs, N)
    t = t[:, :, :, None, :]                    # (B, C, Vs, 1, N)
    z = jnp.matmul(t, itp_mat, precision=jax.lax.Precision.HIGHEST)   # (B, C, Vs, 1, K)
    z = jnp.squeeze(z, -2)                     # (B, C, Vs, K)
    out = jnp.einsum("bcvk,ock->bov", z, conv_w[:, :, 0, :],
                     precision=jax.lax.Precision.HIGHEST) + conv_b[None, :, None]
    return out                                 # (B, C_out, Vs)


if __name__ == "__main__":
    # Small config consistent with the module (graph level 2 -> V=162 so the lane dim
    # actually spans >128 lanes and the lane-dense layout is exercised).
    graph_level = 2
    kernel_size = 7
    stride = 1
    B, C_in, C_out = 2, 4, 8
    V = v_num_dict[graph_level]

    key = jax.random.PRNGKey(0)
    k_itp, k_w, k_b, k_x = jax.random.split(key, 4)

    index, itp_mat = gen_indexes(graph_level, "conv", kernel_size, k_itp)

    # Deterministic Conv2d(C_in, C_out, (1, kernel_size)) parameters.
    conv_w = 0.1 * jax.random.normal(k_w, (C_out, C_in, 1, kernel_size), dtype=jnp.float32)
    conv_b = 0.1 * jax.random.normal(k_b, (C_out,), dtype=jnp.float32)

    # train_select_index as in __init__ (default select_index=None, stride=1).
    select_index1 = np.arange(v_num_dict[graph_level])
    select_index2 = np.arange(v_num_dict[graph_level - stride + 1])
    test_select_index = np.intersect1d(select_index1, select_index2)
    angle_index = np.arange(v_num_dict[graph_level])
    train_select_index = np.intersect1d(test_select_index, angle_index)
    assert len(train_select_index) > 0

    # Input: (B, C_in, V), dim == 3 as asserted in forward.
    x = jax.random.normal(k_x, (B, C_in, V), dtype=jnp.float32)

    out = sphere_conv_forward(x, index, train_select_index, itp_mat, conv_w, conv_b,
                              batch_tile=1)
    out = jax.block_until_ready(out)

    ref = reference_forward(x, jnp.asarray(index), jnp.asarray(train_select_index),
                            itp_mat, conv_w, conv_b)
    np.testing.assert_allclose(np.asarray(out), np.asarray(ref), rtol=1e-3, atol=1e-3)

    print("KERNEL_OK")
</pallas_src>

<mosaic_0001>
module attributes {stable_mosaic.version = 11 : i64} {
  func.func @_sphere_conv_kernel(%arg0: i32, %arg1: memref<1x4x7x162xf32, #tpu.memory_space<vmem>>, %arg2: memref<8x7x162xf32, #tpu.memory_space<vmem>>, %arg3: memref<8x32xf32, #tpu.memory_space<vmem>>, %arg4: memref<8x1xf32, #tpu.memory_space<vmem>>, %arg5: memref<1x8x162xf32, #tpu.memory_space<vmem>>) attributes {dimension_semantics = [#tpu.dimension_semantics<parallel>], iteration_bounds = array<i64: 2>, scalar_prefetch = 0 : i64, scratch_operands = 0 : i64, tpu.core_type = #tpu.core_type<tc>, window_params = [{transform_indices = @transform_0, window_bounds = array<i64: 1, 4, 7, 162>}, {pipeline_mode = #tpu.pipeline_mode<synchronous>, transform_indices = @transform_1, window_bounds = array<i64: 8, 7, 162>}, {pipeline_mode = #tpu.pipeline_mode<synchronous>, transform_indices = @transform_2, window_bounds = array<i64: 8, 32>}, {pipeline_mode = #tpu.pipeline_mode<synchronous>, transform_indices = @transform_3, window_bounds = array<i64: 8, 1>}, {transform_indices = @transform_4, window_bounds = array<i64: 1, 8, 162>}]} {
    %c0 = arith.constant 0 : index
    %c0_0 = arith.constant 0 : index
    %c0_1 = arith.constant 0 : index
    %0 = vector.load %arg2[%c0, %c0_0, %c0_1] : memref<8x7x162xf32, #tpu.memory_space<vmem>>, vector<8x7x162xf32>
    %c0_2 = arith.constant 0 : index
    %c0_3 = arith.constant 0 : index
    %1 = vector.load %arg3[%c0_2, %c0_3] : memref<8x32xf32, #tpu.memory_space<vmem>>, vector<8x32xf32>
    %c0_4 = arith.constant 0 : index
    %c0_5 = arith.constant 0 : index
    %2 = vector.load %arg4[%c0_4, %c0_5] : memref<8x1xf32, #tpu.memory_space<vmem>>, vector<8x1xf32>
    %c0_6 = arith.constant 0 : index
    %c0_7 = arith.constant 0 : index
    %c0_8 = arith.constant 0 : index
    %c0_9 = arith.constant 0 : index
    %3 = vector.load %arg1[%c0_6, %c0_7, %c0_8, %c0_9] : memref<1x4x7x162xf32, #tpu.memory_space<vmem>>, vector<1x4x7x162xf32>
    %4 = vector.shape_cast %3 : vector<1x4x7x162xf32> to vector<4x7x162xf32>
    %cst = arith.constant 0.000000e+00 : f32
    %5 = vector.broadcast %cst : f32 to vector<4x8x162xf32>
    %6 = vector.extract_strided_slice %4 {offsets = [0, 0, 0], sizes = [4, 1, 162], strides = [1, 1, 1]} : vector<4x7x162xf32> to vector<4x1x162xf32>
    %7 = vector.shape_cast %6 : vector<4x1x162xf32> to vector<4x162xf32>
    %8 = vector.shape_cast %7 : vector<4x162xf32> to vector<4x1x162xf32>
    %9 = vector.extract_strided_slice %0 {offsets = [0, 0, 0], sizes = [8, 1, 162], strides = [1, 1, 1]} : vector<8x7x162xf32> to vector<8x1x162xf32>
    %10 = vector.shape_cast %9 : vector<8x1x162xf32> to vector<8x162xf32>
    %11 = vector.shape_cast %10 : vector<8x162xf32> to vector<1x8x162xf32>
    %12 = vector.broadcast %8 : vector<4x1x162xf32> to vector<4x8x162xf32>
    %13 = vector.broadcast %11 : vector<1x8x162xf32> to vector<4x8x162xf32>
    %14 = arith.mulf %12, %13 : vector<4x8x162xf32>
    %15 = arith.addf %5, %14 : vector<4x8x162xf32>
    %16 = vector.extract_strided_slice %4 {offsets = [0, 1, 0], sizes = [4, 1, 162], strides = [1, 1, 1]} : vector<4x7x162xf32> to vector<4x1x162xf32>
    %17 = vector.shape_cast %16 : vector<4x1x162xf32> to vector<4x162xf32>
    %18 = vector.shape_cast %17 : vector<4x162xf32> to vector<4x1x162xf32>
    %19 = vector.extract_strided_slice %0 {offsets = [0, 1, 0], sizes = [8, 1, 162], strides = [1, 1, 1]} : vector<8x7x162xf32> to vector<8x1x162xf32>
    %20 = vector.shape_cast %19 : vector<8x1x162xf32> to vector<8x162xf32>
    %21 = vector.shape_cast %20 : vector<8x162xf32> to vector<1x8x162xf32>
    %22 = vector.broadcast %18 : vector<4x1x162xf32> to vector<4x8x162xf32>
    %23 = vector.broadcast %21 : vector<1x8x162xf32> to vector<4x8x162xf32>
    %24 = arith.mulf %22, %23 : vector<4x8x162xf32>
    %25 = arith.addf %15, %24 : vector<4x8x162xf32>
    %26 = vector.extract_strided_slice %4 {offsets = [0, 2, 0], sizes = [4, 1, 162], strides = [1, 1, 1]} : vector<4x7x162xf32> to vector<4x1x162xf32>
    %27 = vector.shape_cast %26 : vector<4x1x162xf32> to vector<4x162xf32>
    %28 = vector.shape_cast %27 : vector<4x162xf32> to vector<4x1x162xf32>
    %29 = vector.extract_strided_slice %0 {offsets = [0, 2, 0], sizes = [8, 1, 162], strides = [1, 1, 1]} : vector<8x7x162xf32> to vector<8x1x162xf32>
    %30 = vector.shape_cast %29 : vector<8x1x162xf32> to vector<8x162xf32>
    %31 = vector.shape_cast %30 : vector<8x162xf32> to vector<1x8x162xf32>
    %32 = vector.broadcast %28 : vector<4x1x162xf32> to vector<4x8x162xf32>
    %33 = vector.broadcast %31 : vector<1x8x162xf32> to vector<4x8x162xf32>
    %34 = arith.mulf %32, %33 : vector<4x8x162xf32>
    %35 = arith.addf %25, %34 : vector<4x8x162xf32>
    %36 = vector.extract_strided_slice %4 {offsets = [0, 3, 0], sizes = [4, 1, 162], strides = [1, 1, 1]} : vector<4x7x162xf32> to vector<4x1x162xf32>
    %37 = vector.shape_cast %36 : vector<4x1x162xf32> to vector<4x162xf32>
    %38 = vector.shape_cast %37 : vector<4x162xf32> to vector<4x1x162xf32>
    %39 = vector.extract_strided_slice %0 {offsets = [0, 3, 0], sizes = [8, 1, 162], strides = [1, 1, 1]} : vector<8x7x162xf32> to vector<8x1x162xf32>
    %40 = vector.shape_cast %39 : vector<8x1x162xf32> to vector<8x162xf32>
    %41 = vector.shape_cast %40 : vector<8x162xf32> to vector<1x8x162xf32>
    %42 = vector.broadcast %38 : vector<4x1x162xf32> to vector<4x8x162xf32>
    %43 = vector.broadcast %41 : vector<1x8x162xf32> to vector<4x8x162xf32>
    %44 = arith.mulf %42, %43 : vector<4x8x162xf32>
    %45 = arith.addf %35, %44 : vector<4x8x162xf32>
    %46 = vector.extract_strided_slice %4 {offsets = [0, 4, 0], sizes = [4, 1, 162], strides = [1, 1, 1]} : vector<4x7x162xf32> to vector<4x1x162xf32>
    %47 = vector.shape_cast %46 : vector<4x1x162xf32> to vector<4x162xf32>
    %48 = vector.shape_cast %47 : vector<4x162xf32> to vector<4x1x162xf32>
    %49 = vector.extract_strided_slice %0 {offsets = [0, 4, 0], sizes = [8, 1, 162], strides = [1, 1, 1]} : vector<8x7x162xf32> to vector<8x1x162xf32>
    %50 = vector.shape_cast %49 : vector<8x1x162xf32> to vector<8x162xf32>
    %51 = vector.shape_cast %50 : vector<8x162xf32> to vector<1x8x162xf32>
    %52 = vector.broadcast %48 : vector<4x1x162xf32> to vector<4x8x162xf32>
    %53 = vector.broadcast %51 : vector<1x8x162xf32> to vector<4x8x162xf32>
    %54 = arith.mulf %52, %53 : vector<4x8x162xf32>
    %55 = arith.addf %45, %54 : vector<4x8x162xf32>
    %56 = vector.extract_strided_slice %4 {offsets = [0, 5, 0], sizes = [4, 1, 162], strides = [1, 1, 1]} : vector<4x7x162xf32> to vector<4x1x162xf32>
    %57 = vector.shape_cast %56 : vector<4x1x162xf32> to vector<4x162xf32>
    %58 = vector.shape_cast %57 : vector<4x162xf32> to vector<4x1x162xf32>
    %59 = vector.extract_strided_slice %0 {offsets = [0, 5, 0], sizes = [8, 1, 162], strides = [1, 1, 1]} : vector<8x7x162xf32> to vector<8x1x162xf32>
    %60 = vector.shape_cast %59 : vector<8x1x162xf32> to vector<8x162xf32>
    %61 = vector.shape_cast %60 : vector<8x162xf32> to vector<1x8x162xf32>
    %62 = vector.broadcast %58 : vector<4x1x162xf32> to vector<4x8x162xf32>
    %63 = vector.broadcast %61 : vector<1x8x162xf32> to vector<4x8x162xf32>
    %64 = arith.mulf %62, %63 : vector<4x8x162xf32>
    %65 = arith.addf %55, %64 : vector<4x8x162xf32>
    %66 = vector.extract_strided_slice %4 {offsets = [0, 6, 0], sizes = [4, 1, 162], strides = [1, 1, 1]} : vector<4x7x162xf32> to vector<4x1x162xf32>
    %67 = vector.shape_cast %66 : vector<4x1x162xf32> to vector<4x162xf32>
    %68 = vector.shape_cast %67 : vector<4x162xf32> to vector<4x1x162xf32>
    %69 = vector.extract_strided_slice %0 {offsets = [0, 6, 0], sizes = [8, 1, 162], strides = [1, 1, 1]} : vector<8x7x162xf32> to vector<8x1x162xf32>
    %70 = vector.shape_cast %69 : vector<8x1x162xf32> to vector<8x162xf32>
    %71 = vector.shape_cast %70 : vector<8x162xf32> to vector<1x8x162xf32>
    %72 = vector.broadcast %68 : vector<4x1x162xf32> to vector<4x8x162xf32>
    %73 = vector.broadcast %71 : vector<1x8x162xf32> to vector<4x8x162xf32>
    %74 = arith.mulf %72, %73 : vector<4x8x162xf32>
    %75 = arith.addf %65, %74 : vector<4x8x162xf32>
    %76 = vector.shape_cast %75 : vector<4x8x162xf32> to vector<32x162xf32>
    %cst_10 = arith.constant dense<0.000000e+00> : vector<8x162xf32>
    %77 = tpu.matmul %1, %76, %cst_10 {dimension_numbers = #tpu.dot_dimension_numbers<[1], [0], [0], [1], [0, 0, 1, 1], [], []>} : vector<8x32xf32>, vector<32x162xf32>, vector<8x162xf32> -> vector<8x162xf32>
    %78 = vector.broadcast %2 : vector<8x1xf32> to vector<8x162xf32>
    %79 = arith.addf %77, %78 : vector<8x162xf32>
    %c0_11 = arith.constant 0 : index
    %c0_12 = arith.constant 0 : index
    %c0_13 = arith.constant 0 : index
    %80 = vector.load %arg5[%c0_11, %c0_12, %c0_13] : memref<1x8x162xf32, #tpu.memory_space<vmem>>, vector<1x8x162xf32>
    %81 = vector.shape_cast %80 : vector<1x8x162xf32> to vector<8x162xf32>
    %82 = vector.shape_cast %79 : vector<8x162xf32> to vector<1x8x162xf32>
    tpu.vector_store %arg5[%c0_11, %c0_12, %c0_13], %82 {strides = array<i32>} : memref<1x8x162xf32, #tpu.memory_space<vmem>>, vector<1x8x162xf32>,
    return
  }
  func.func @transform_0(%arg0: i32) -> (i32, i32, i32, i32) {
    %c0_i32 = arith.constant 0 : i32
    %c0_i32_0 = arith.constant 0 : i32
    %c0_i32_1 = arith.constant 0 : i32
    %c0_i32_2 = arith.constant 0 : i32
    return %arg0, %c0_i32, %c0_i32_0, %c0_i32_1 : i32, i32, i32, i32
  }
  func.func @transform_1(%arg0: i32) -> (i32, i32, i32) {
    %c0_i32 = arith.constant 0 : i32
    %c0_i32_0 = arith.constant 0 : i32
    %c0_i32_1 = arith.constant 0 : i32
    %c0_i32_2 = arith.constant 0 : i32
    return %c0_i32, %c0_i32_0, %c0_i32_1 : i32, i32, i32
  }
  func.func @transform_2(%arg0: i32) -> (i32, i32) {
    %c0_i32 = arith.constant 0 : i32
    %c0_i32_0 = arith.constant 0 : i32
    %c0_i32_1 = arith.constant 0 : i32
    return %c0_i32, %c0_i32_0 : i32, i32
  }
  func.func @transform_3(%arg0: i32) -> (i32, i32) {
    %c0_i32 = arith.constant 0 : i32
    %c0_i32_0 = arith.constant 0 : i32
    %c0_i32_1 = arith.constant 0 : i32
    return %c0_i32, %c0_i32_0 : i32, i32
  }
  func.func @transform_4(%arg0: i32) -> (i32, i32, i32) {
    %c0_i32 = arith.constant 0 : i32
    %c0_i32_0 = arith.constant 0 : i32
    %c0_i32_1 = arith.constant 0 : i32
    return %arg0, %c0_i32, %c0_i32_0 : i32, i32, i32
  }
}

</mosaic_0001>

<bundles_post_ra>
// kernel: tpu_custom_call.1
= control target key start
LH: loop header
LB: loop body
LE: loop exit
PB: predicated region body
PF: predicated region fallthrough
CT: control target
= control target key end

     0   :  { %9 = vsyncpa [#allocation3], 0  ;;  %s1728_s0 = inlined_call_operand.vmem [shape: f32[2,4,7,162], index: 0, kind: input, shape index: {}]   ;;  %s1729_s1 = inlined_call_operand.vmem [shape: f32[8,7,162], index: 1, kind: input, shape index: {}]   ;;  %s1730_s2 = inlined_call_operand.vmem [shape: f32[8,32], index: 2, kind: input, shape index: {}]   ;;  %s1731_s3 = inlined_call_operand.vmem [shape: f32[8,1], index: 3, kind: input, shape index: {}]   ;;  %s1732_s4 = inlined_call_operand.hbm [shape: f32[2,8,162], index: 4, kind: output, shape index: {}]  }
   0x1   :  { %11 = vsyncpa [#allocation3 + $0x1], 0  ;;  %s1105_s15 = smov 0   ;;  %s1107_s16 = smov 0  }
   0x2   :  { %s1109_s17 = smov 0   ;;  %s1111_s18 = smov 0  }
   0x3 LB: > { %s1126_s19 = sadd.s32 4294967295, %s1075_s18   ;;  %s948_s20 = sadd.s32 4294967294, %s1075_s18   ;;  %s1075_s18 = sphi %s1111_s18, %s1738_s18   ;;  %s1071_s17 = sphi %s1109_s17, %s1737_s17   ;;  %s1067_s16 = sphi %s1107_s16, %s1736_s16   ;;  %s1063_s15 = sphi %s1105_s15, %s1735_s15  }
   0x4   : > { %s1130_s21 = sadd.s32 1, %s1075_s18   ;;  %s113_s22 = sadd.s32 1, %s1071_s17 }
   0x5   : > { %s110_s23 = ssub.s32 %s1075_s18, %s1130_s21  ;;  %p123_p0 = scmp.ne.s32.totalorder %s1071_s17, %s1067_s16 }
   0x6   : > { %p111_p1 = scmp.eq.s32.totalorder %s110_s23, 0  ;;  %p124_p2 = scmp.eq.s32.totalorder %s1126_s19, 1 }
   0x7   : > { %p129_p3 = scmp.ne.s32.totalorder %s1067_s16, %s1063_s15  ;;  %p130_p4 = scmp.eq.s32.totalorder %s948_s20, 1 }
   0x8   : > { %s1141_s24 = scalar_select %p111_p1, %s1071_s17, %s113_s22  }
   0x9   : > { %p1143_p5 = por %p124_p2, %p123_p0  ;;  %p1147_p6 = por %p130_p4, %p129_p3 }
   0xa   : > { %p951_p7 = scmp.ge.s32.totalorder %s1075_s18, 1  ;;  %p165_p8 = scmp.lt.s32.totalorder %s1075_s18, 3 }
   0xc   : > { %p166_p9 = pnand %p951_p7, %p165_p8 }
   0xd   : > { %p191_p10 = scmp.lt.s32.totalorder (!%p166_p9), %s1126_s19, 1  ;;  %v1157_v0 = vld [vmem:[%s1729_s1 + $0x18] sm:$0x7f] (!%p166_p9)  ;;  %v222_v1 = vlaneseq (!%p166_p9)  ;;  %vm271_vm0 = vcmask (!%p166_p9), 1041409   ;;  %v1162_v2 = vld [vmem:[%s1729_s1 + $0x28] sm:$0x7f] (!%p166_p9) }
   0xe   : > { %169 = sbr.rel (%p166_p9) target bundleno = 348 (0x15c), region = 36  ;;  %v1167_v3 = vld [vmem:[%s1729_s1 + $0x38] sm:$0x7f] (!%p166_p9)  ;;  %v1172_v4 = vld [vmem:[%s1729_s1 + $0x48] sm:$0x7f] (!%p166_p9)  ;;  %vm274_vm1 = vcmask (!%p166_p9), 1042434  }
   0xf   : > { %v1178_v5 = vld [vmem:[%s1729_s1 + $0x58] sm:$0x7f] (!%p166_p9)  ;;  %v1183_v6 = vld [vmem:[%s1729_s1 + $0x68] sm:$0x7f] (!%p166_p9)  ;;  %v1185_v7 = vshrl.u32 (!%p166_p9), %v222_v1, 7  ;;  %vm277_vm2 = vcmask (!%p166_p9), 1043459  }
  0x10   : > { %v1190_v8 = vld [vmem:[%s1729_s1 + $0x78] sm:$0x7f] (!%p166_p9)  ;;  %vm280_vm3 = vcmask (!%p166_p9), 1044484   ;;  %vm283_vm4 = vcmask (!%p166_p9), 1045509   ;;  %vm286_vm5 = vcmask (!%p166_p9), 1046534   ;;  %vm289_vm6 = vcmask (!%p166_p9), 1047559  }
  0x11   : > { %v1193_v9 = vsub.s32 (!%p166_p9), 0, %v1185_v7  ;;  %v291_v10 = vrot.slane (!%p166_p9), %v1157_v0, 7  ;;  %v1204_v11 = vld [vmem:[%s1729_s1 + $0x8] sm:$0x7f] (!%p166_p9)  ;;  %v293_v12 = vrot.slane (!%p166_p9), %v1162_v2, 6  ;;  %v295_v13 = vrot.slane (!%p166_p9), %v1167_v3, 5 }
  0x12   : > { %v297_v14 = vrot.slane (!%p166_p9), %v1172_v4, 4  ;;  %v299_v15 = vrot.slane (!%p166_p9), %v1178_v5, 3  ;;  %v301_v19 = vrot.slane (!%p166_p9), %v1183_v6, 2  ;;  %v303_v20 = vrot.slane (!%p166_p9), %v1190_v8, 1  ;;  %s188_s8 = sand.u32 (!%p166_p9), 1, %s1067_s16   ;;  %s962_s10 = sshll.u32 (!%p166_p9), %s1126_s19, 8 }
  0x13   : > { %v292_v18 = vsel (!%p166_p9), %vm271_vm0, %v291_v10, %v1204_v11  ;;  %v1226_v24 = vsub.s32 (!%p166_p9), 1, %v1185_v7  ;;  %v369_v26 = vrot.slane (!%p166_p9), %v1204_v11, 1  ;;  %v371_v27 = vrot.slane (!%p166_p9), %v1162_v2, 7  ;;  %s1686_s20 = scalar_lea.hbm (!%p166_p9), %s1732_s4, %s962_s10  ;;  %s1079_s23 = smov (!%p166_p9), [#allocation2]  }
  0x14   : > { %v294_v23 = vsel (!%p166_p9), %vm274_vm1, %v293_v12, %v292_v18  ;;  %v373_v28 = vrot.slane (!%p166_p9), %v1167_v3, 6  ;;  %v375_v32 = vrot.slane (!%p166_p9), %v1172_v4, 5  ;;  %v377_v35 = vrot.slane (!%p166_p9), %v1178_v5, 4  ;;  %s1017_s27 = sshll.u32 (!%p166_p9), %s1079_s23, 4  ;;  %s1018_s27 = int_to_ptr.vmem [resolvable:$false] %s1017_s27 }
  0x15   : > { %s192_s9 = scalar_select %p191_p10, %s1126_s19, 1  ;;  %v296_v25 = vsel %vm277_vm2, %v295_v13, %v294_v23  ;;  %v370_v34 = vsel %vm271_vm0, %v1157_v0, %v369_v26  ;;  %v379_v36 = vrot.slane %v1183_v6, 3  ;;  %v381_v39 = vrot.slane %v1190_v8, 2 }
  0x16   : > { %v298_v29 = vsel %vm280_vm3, %v297_v14, %v296_v25  ;;  %v372_v38 = vsel %vm274_vm1, %v371_v27, %v370_v34  ;;  %v1247_v40 = vsub.s32 2, %v1185_v7  ;;  %v447_v43 = vrot.slane %v1204_v11, 2  ;;  %s875_s19 = scalar_lea.sflag [#allocation3], %s188_s8  ;;  %s1019_s29 = scalar_lea.vmem %s1018_s27, 512 }
  0x17   : > { %s961_s22 = sshll.u32 %s192_s9, 6  ;;  %v300_v33 = vsel %vm283_vm4, %v299_v15, %v298_v29  ;;  %v374_v42 = vsel %vm277_vm2, %v373_v28, %v372_v38  ;;  %v448_v44 = vrot.slane %v1157_v0, 1  ;;  %v451_v52 = vrot.slane %v1167_v3, 7  ;;  %s952_s9 = sshll.u32 %s188_s8, 4 }
  0x18   : > { %s1199_s28 = scalar_lea.vmem %s1728_s0, %s961_s22  ;;  %v302_v37 = vsel %vm286_vm5, %v301_v19, %v300_v33  ;;  %v376_v47 = vsel %vm280_vm3, %v375_v32, %v374_v42  ;;  %v453_v55 = vrot.slane %v1172_v4, 6  ;;  %v455_v56 = vrot.slane %v1178_v5, 5  ;;  %s190_s11 = scalar_lea.vmem [#allocation2], %s952_s9 }
  0x19   : > { %v1211_v16 = vld [vmem:[%s1199_s28 + $0x8] sm:$0x7f]  ;;  %v1214_v17 = vld [vmem:[%s1199_s28 + $0x18] sm:$0x7f]  ;;  %v1250_v41 = vsel %vm289_vm6, %v303_v20, %v302_v37  ;;  %v378_v49 = vsel %vm283_vm4, %v377_v35, %v376_v47  ;;  %v449_v51 = vsel %vm271_vm0, %v448_v44, %v447_v43  ;;  %v457_v59 = vrot.slane %v1183_v6, 4  ;;  %s889_s12 = sshll.u32 %s190_s11, 4  ;;  %s1688_s12 = int_to_ptr.vmem [resolvable:$true] %s889_s12 }
  0x1a   : > { %v229_v21 = vrot.slane %v1211_v16, %v1193_v9  ;;  %v237_v22 = vrot.slane %v1214_v17, %v1193_v9  ;;  %v330_v30 = vrot.slane %v1211_v16, %v1226_v24  ;;  %v338_v31 = vrot.slane %v1214_v17, %v1226_v24  ;;  %s1013_s22 = scalar_lea.vmem %s1688_s12, 256  ;;  %p1020_p0 = scmp.lt.s32.totalorder %s1688_s12, %s1018_s27 }
  0x1b   : > { %v408_v48 = vrot.slane %v1211_v16, %v1247_v40  ;;  %v416_v50 = vrot.slane %v1214_v17, %v1247_v40  ;;  %v380_v53 = vsel %vm286_vm5, %v379_v36, %v378_v49  ;;  %v450_v54 = vsel %vm274_vm1, %v1162_v2, %v449_v51  ;;  %p1014_p11 = scmp.ne.s32.totalorder %s1688_s12, %s1013_s22  ;;  %p1021_p1 = scmp.lt.s32.totalorder %s1019_s29, %s1013_s22 }
  0x1c   : > { %v308_v45 = vmul.f32 %v1250_v41, %v229_v21  ;;  %v310_v46 = vmul.f32 %v1250_v41, %v237_v22  ;;  %v1271_v57 = vsel %vm289_vm6, %v381_v39, %v380_v53  ;;  %v452_v58 = vsel %vm277_vm2, %v451_v52, %v450_v54 }
  0x1d   : > { %v459_v60 = vrot.slane %v1190_v8, 3  ;;  %v386_v61 = vmul.f32 %v1271_v57, %v330_v30  ;;  %v388_v62 = vmul.f32 %v1271_v57, %v338_v31  ;;  %v454_v63 = vsel %vm280_vm3, %v453_v55, %v452_v58  ;;  %p1015_p12 = pnand %p1014_p11, %p1143_p5  ;;  %p1022_p2 = por %p1021_p1, %p1020_p0 }
  0x1e   : > { %v1280_v1 = vsub.s32 3, %v1185_v7  ;;  %v456_v10 = vsel %vm283_vm4, %v455_v56, %v454_v63  ;;  %v525_v12 = vrot.slane %v1204_v11, 3  ;;  %v526_v13 = vrot.slane %v1157_v0, 2 }
  0x1f   : > { %v528_v14 = vrot.slane %v1162_v2, 1  ;;  %v394_v15 = vadd.f32 %v386_v61, %v308_v45  ;;  %v396_v18 = vadd.f32 %v388_v62, %v310_v46  ;;  %v458_v19 = vsel %vm286_vm5, %v457_v59, %v456_v10  ;;  %p1016_p13 = pneg %p1015_p12 }
  0x20   : > { %v486_v20 = vrot.slane %v1211_v16, %v1280_v1  ;;  %v1290_v21 = vsel %vm289_vm6, %v459_v60, %v458_v19  ;;  %v494_v22 = vrot.slane %v1214_v17, %v1280_v1  ;;  %v527_v23 = vsel %vm271_vm0, %v526_v13, %v525_v12 }
  0x21   : > { %v531_v25 = vrot.slane %v1172_v4, 7  ;;  %v464_v26 = vmul.f32 %v1290_v21, %v408_v48  ;;  %v466_v27 = vmul.f32 %v1290_v21, %v416_v50  ;;  %v529_v28 = vsel %vm274_vm1, %v528_v14, %v527_v23  ;;  %p1023_p3 = pnand %p1022_p2, %p1016_p13 }
  0x22   : > { %v533_v29 = vrot.slane %v1178_v5, 6  ;;  %v530_v30 = vsel %vm277_vm2, %v1167_v3, %v529_v28  ;;  %v535_v31 = vrot.slane %v1183_v6, 5  ;;  %v537_v32 = vrot.slane %v1190_v8, 4 }
  0x23   : > { %v1305_v33 = vsub.s32 4, %v1185_v7  ;;  %v472_v34 = vadd.f32 %v464_v26, %v394_v15  ;;  %v474_v35 = vadd.f32 %v466_v27, %v396_v18  ;;  %v532_v36 = vsel %vm280_vm3, %v531_v25, %v530_v30 }
  0x24   : > { %v603_v37 = vrot.slane %v1204_v11, 4  ;;  %v534_v38 = vsel %vm283_vm4, %v533_v29, %v532_v36  ;;  %v604_v43 = vrot.slane %v1157_v0, 3  ;;  %v606_v45 = vrot.slane %v1162_v2, 2 }
  0x25   : > { %v564_v39 = vrot.slane %v1211_v16, %v1305_v33  ;;  %v572_v42 = vrot.slane %v1214_v17, %v1305_v33  ;;  %v536_v44 = vsel %vm286_vm5, %v535_v31, %v534_v38  ;;  %v608_v46 = vrot.slane %v1167_v3, 1 }
  0x26   : > { %v611_v47 = vrot.slane %v1178_v5, 7  ;;  %v1320_v48 = vsel %vm289_vm6, %v537_v32, %v536_v44  ;;  %v605_v49 = vsel %vm271_vm0, %v604_v43, %v603_v37  ;;  %v613_v50 = vrot.slane %v1183_v6, 6 }
  0x27   : > { %v615_v51 = vrot.slane %v1190_v8, 5  ;;  %v542_v52 = vmul.f32 %v1320_v48, %v486_v20  ;;  %v544_v53 = vmul.f32 %v1320_v48, %v494_v22  ;;  %v607_v54 = vsel %vm274_vm1, %v606_v45, %v605_v49  ;;  %v1403_v49 = vld [vmem:[%s1729_s1 + $0x40] sm:$0x7f] }
  0x28   : > { %v1329_v55 = vsub.s32 5, %v1185_v7  ;;  %v609_v56 = vsel %vm277_vm2, %v608_v46, %v607_v54  ;;  %v681_v58 = vrot.slane %v1204_v11, 5  ;;  %v682_v59 = vrot.slane %v1157_v0, 4 }
  0x29   : > { %v684_v60 = vrot.slane %v1162_v2, 3  ;;  %v550_v61 = vadd.f32 %v542_v52, %v472_v34  ;;  %v552_v62 = vadd.f32 %v544_v53, %v474_v35  ;;  %v610_v63 = vsel %vm280_vm3, %v1172_v4, %v609_v56  ;;  %v1410_v52 = vld [vmem:[%s1729_s1 + $0x50] sm:$0x7f] }
  0x2a   : > { %v642_v10 = vrot.slane %v1211_v16, %v1329_v55  ;;  %v612_v12 = vsel %vm283_vm4, %v611_v47, %v610_v63  ;;  %v650_v13 = vrot.slane %v1214_v17, %v1329_v55  ;;  %v683_v14 = vsel %vm271_vm0, %v682_v59, %v681_v58  ;;  %v1425_v59 = vld [vmem:[%s1729_s1 + $0x70] sm:$0x7f] }
  0x2b   : > { %v686_v15 = vrot.slane %v1167_v3, 2  ;;  %v614_v18 = vsel %vm286_vm5, %v613_v50, %v612_v12  ;;  %v685_v19 = vsel %vm274_vm1, %v684_v60, %v683_v14  ;;  %v688_v20 = vrot.slane %v1172_v4, 1 }
  0x2c   : > { %v691_v22 = vrot.slane %v1183_v6, 7  ;;  %v1349_v23 = vsel %vm289_vm6, %v615_v51, %v614_v18  ;;  %v693_v26 = vrot.slane %v1190_v8, 6  ;;  %v1354_v27 = vsub.s32 6, %v1185_v7 }
  0x2d   : > { %v687_v25 = vsel %vm277_vm2, %v686_v15, %v685_v19  ;;  %v620_v28 = vmul.f32 %v1349_v23, %v564_v39  ;;  %v622_v29 = vmul.f32 %v1349_v23, %v572_v42  ;;  %v759_v31 = vrot.slane %v1204_v11, 6  ;;  %v1370_v42 = vld [vmem:[%s1199_s28] sm:$0x7f]  ;;  %v1373_v11 = vld [vmem:[%s1199_s28 + $0x10] sm:$0x7f] }
  0x2e   : > { %v689_v30 = vsel %vm280_vm3, %v688_v20, %v687_v25  ;;  %v720_v34 = vrot.slane %v1211_v16, %v1354_v27  ;;  %v728_v35 = vrot.slane %v1214_v17, %v1354_v27  ;;  %v760_v7 = vrot.slane %v1157_v0, 5  ;;  %v1384_v0 = vld [vmem:[%s1729_s1 + $0x10] sm:$0x7f] }
  0x2f   : > { %v690_v32 = vsel %vm283_vm4, %v1178_v5, %v689_v30  ;;  %v628_v36 = vadd.f32 %v620_v28, %v550_v61  ;;  %v630_v37 = vadd.f32 %v622_v29, %v552_v62  ;;  %v762_v39 = vrot.slane %v1162_v2, 4  ;;  %v1389_v2 = vld [vmem:[%s1729_s1 + $0x20] sm:$0x7f] }
  0x30   : > { %v692_v38 = vsel %vm286_vm5, %v691_v22, %v690_v32  ;;  %v761_v16 = vsel %vm271_vm0, %v760_v7, %v759_v31  ;;  %v764_v44 = vrot.slane %v1167_v3, 3  ;;  %v766_v17 = vrot.slane %v1172_v4, 2  ;;  %v1398_v4 = vld [vmem:[%s1729_s1 + $0x30] sm:$0x7f]  ;;  %v1432_v62 = vld [vmem:[%s1729_s1] sm:$0x7f] }
  0x31   : > { %v1376_v43 = vsel %vm289_vm6, %v693_v26, %v692_v38  ;;  %v763_v47 = vsel %vm274_vm1, %v762_v39, %v761_v16  ;;  %v768_v3 = vrot.slane %v1178_v5, 1  ;;  %v771_v51 = vrot.slane %v1190_v8, 7  ;;  %v1415_v5 = vld [vmem:[%s1729_s1 + $0x60] sm:$0x7f] }
  0x32   : > { %v698_v45 = vmul.f32 %v1376_v43, %v642_v10  ;;  %v700_v46 = vmul.f32 %v1376_v43, %v650_v13  ;;  %v765_v50 = vsel %vm277_vm2, %v764_v44, %v763_v47  ;;  %v225_v53 = vrot.slane %v1370_v42, %v1193_v9 }
  0x33   : > { %v233_v54 = vrot.slane %v1373_v11, %v1193_v9  ;;  %v767_v8 = vsel %vm280_vm3, %v766_v17, %v765_v50  ;;  %v270_v60 = vrot.slane %v1384_v0, 7  ;;  %v273_v63 = vrot.slane %v1389_v2, 6 }
  0x34   : > { %v706_v56 = vadd.f32 %v698_v45, %v628_v36  ;;  %v708_v58 = vadd.f32 %v700_v46, %v630_v37  ;;  %v769_v61 = vsel %vm283_vm4, %v768_v3, %v767_v8  ;;  %v276_v10 = vrot.slane %v1398_v4, 5 }
  0x35   : > { %v279_v12 = vrot.slane %v1403_v49, 4  ;;  %v770_v13 = vsel %vm286_vm5, %v1183_v6, %v769_v61  ;;  %v272_v14 = vsel %vm271_vm0, %v270_v60, %v1432_v62  ;;  %v282_v15 = vrot.slane %v1410_v52, 3 }
  0x36   : > { %v285_v18 = vrot.slane %v1415_v5, 2  ;;  %v1444_v19 = vsel %vm289_vm6, %v771_v51, %v770_v13  ;;  %v275_v20 = vsel %vm274_vm1, %v273_v63, %v272_v14  ;;  %v288_v22 = vrot.slane %v1425_v59, 1 }
  0x37   : > { %v326_v25 = vrot.slane %v1370_v42, %v1226_v24  ;;  %v776_v26 = vmul.f32 %v1444_v19, %v720_v34  ;;  %v778_v6 = vmul.f32 %v1444_v19, %v728_v35  ;;  %v278_v28 = vsel %vm277_vm2, %v276_v10, %v275_v20 }
  0x38   : > { %v334_v29 = vrot.slane %v1373_v11, %v1226_v24  ;;  %v281_v30 = vsel %vm280_vm3, %v279_v12, %v278_v28  ;;  %v355_v31 = vrot.slane %v1432_v62, 1  ;;  %v357_v32 = vrot.slane %v1389_v2, 7 }
  0x39   : > { %v359_v7 = vrot.slane %v1398_v4, 6  ;;  %v784_v36 = vadd.f32 %v776_v26, %v706_v56  ;;  %v786_v37 = vadd.f32 %v778_v6, %v708_v58  ;;  %v284_v38 = vsel %vm283_vm4, %v282_v15, %v281_v30 }
  0x3a   : > { %v361_v34 = vrot.slane %v1403_v49, 5  ;;  %v287_v35 = vsel %vm286_vm5, %v285_v18, %v284_v38  ;;  %v356_v39 = vsel %vm271_vm0, %v1384_v0, %v355_v31  ;;  %v363_v16 = vrot.slane %v1410_v52, 4 }
  0x3b   : > { %v365_v44 = vrot.slane %v1415_v5, 3  ;;  %v963_v17 = vpack.c.bf16 %v786_v37, %v784_v36  ;;  %v1467_v45 = vsel %vm289_vm6, %v288_v22, %v287_v35  ;;  %v358_v46 = vsel %vm274_vm1, %v357_v32, %v356_v39 }
  0x3c   : > { %v367_v47 = vrot.slane %v1425_v59, 2  ;;  %v307_v3 = vmul.f32 %v1467_v45, %v225_v53  ;;  %v309_v50 = vmul.f32 %v1467_v45, %v233_v54  ;;  %v360_v51 = vsel %vm277_vm2, %v359_v7, %v358_v46 }
  0x3d   : > { %v404_v56 = vrot.slane %v1370_v42, %v1247_v40  ;;  %964 = vmatprep.subr.bf16.mxu0 %v963_v17  ;;  %v362_v58 = vsel %vm280_vm3, %v361_v34, %v360_v51  ;;  %v412_v8 = vrot.slane %v1373_v11, %v1247_v40  ;;  %v433_v60 = vrot.slane %v1432_v62, 2 }
  0x3e   : > { %v434_v61 = vrot.slane %v1384_v0, 1  ;;  %v364_v63 = vsel %vm283_vm4, %v363_v16, %v362_v58  ;;  %v437_v53 = vrot.slane %v1398_v4, 7  ;;  %v439_v54 = vrot.slane %v1403_v49, 6 }
  0x3f   : > { %v441_v10 = vrot.slane %v1410_v52, 5  ;;  %v366_v12 = vsel %vm286_vm5, %v365_v44, %v364_v63  ;;  %v443_v14 = vrot.slane %v1415_v5, 4  ;;  %v445_v15 = vrot.slane %v1425_v59, 3 }
  0x40   : > { %v435_v13 = vsel %vm271_vm0, %v434_v61, %v433_v60  ;;  %v1490_v18 = vsel %vm289_vm6, %v367_v47, %v366_v12  ;;  %v482_v22 = vrot.slane %v1370_v42, %v1280_v1  ;;  %v490_v26 = vrot.slane %v1373_v11, %v1280_v1 }
  0x41   : > { %v436_v20 = vsel %vm274_vm1, %v1389_v2, %v435_v13  ;;  %v385_v6 = vmul.f32 %v1490_v18, %v326_v25  ;;  %v387_v28 = vmul.f32 %v1490_v18, %v334_v29  ;;  %v511_v31 = vrot.slane %v1432_v62, 3 }
  0x42   : > { %v438_v30 = vsel %vm277_vm2, %v437_v53, %v436_v20  ;;  %v512_v7 = vrot.slane %v1384_v0, 2  ;;  %v514_v36 = vrot.slane %v1389_v2, 1  ;;  %v517_v37 = vrot.slane %v1403_v49, 7 }
  0x43   : > { %v440_v32 = vsel %vm280_vm3, %v439_v54, %v438_v30  ;;  %v393_v38 = vadd.f32 %v385_v6, %v307_v3  ;;  %v395_v34 = vadd.f32 %v387_v28, %v309_v50  ;;  %v519_v25 = vrot.slane %v1410_v52, 6 }
  0x44   : > { %v442_v35 = vsel %vm283_vm4, %v441_v10, %v440_v32  ;;  %v513_v39 = vsel %vm271_vm0, %v512_v7, %v511_v31  ;;  %v521_v16 = vrot.slane %v1415_v5, 5  ;;  %v523_v44 = vrot.slane %v1425_v59, 4 }
  0x45   : > { %v444_v29 = vsel %vm286_vm5, %v443_v14, %v442_v35  ;;  %v515_v46 = vsel %vm274_vm1, %v514_v36, %v513_v39  ;;  %v560_v47 = vrot.slane %v1370_v42, %v1305_v33  ;;  %v568_v3 = vrot.slane %v1373_v11, %v1305_v33 }
  0x46   : > { %v1513_v17 = vsel %vm289_vm6, %v445_v15, %v444_v29  ;;  %v516_v58 = vsel %vm277_vm2, %v1398_v4, %v515_v46  ;;  %v589_v60 = vrot.slane %v1432_v62, 4  ;;  %v590_v63 = vrot.slane %v1384_v0, 3 }
  0x47   : > { %v463_v50 = vmul.f32 %v1513_v17, %v404_v56  ;;  %v465_v51 = vmul.f32 %v1513_v17, %v412_v8  ;;  %v518_v61 = vsel %vm280_vm3, %v517_v37, %v516_v58  ;;  %v592_v53 = vrot.slane %v1389_v2, 2 }
  0x48   : > { %v594_v54 = vrot.slane %v1398_v4, 1  ;;  %v520_v13 = vsel %vm283_vm4, %v519_v25, %v518_v61  ;;  %v597_v56 = vrot.slane %v1410_v52, 7  ;;  %v591_v14 = vsel %vm271_vm0, %v590_v63, %v589_v60 }
  0x49   : > { %v471_v10 = vadd.f32 %v463_v50, %v393_v38  ;;  %v473_v12 = vadd.f32 %v465_v51, %v395_v34  ;;  %v522_v8 = vsel %vm286_vm5, %v521_v16, %v520_v13  ;;  %v599_v15 = vrot.slane %v1415_v5, 6 }
  0x4a   : > { %v601_v20 = vrot.slane %v1425_v59, 5  ;;  %v1536_v6 = vsel %vm289_vm6, %v523_v44, %v522_v8  ;;  %v593_v28 = vsel %vm274_vm1, %v592_v53, %v591_v14  ;;  %v638_v30 = vrot.slane %v1370_v42, %v1329_v55  ;;  %v1578_v14 = vld [vmem:[%s1199_s28 + $0x38] sm:$0x7f] }
  0x4b   : > { %v646_v31 = vrot.slane %v1373_v11, %v1329_v55  ;;  %v541_v32 = vmul.f32 %v1536_v6, %v482_v22  ;;  %v543_v7 = vmul.f32 %v1536_v6, %v490_v26  ;;  %v595_v36 = vsel %vm277_vm2, %v594_v54, %v593_v28 }
  0x4c   : > { %v667_v37 = vrot.slane %v1432_v62, 5  ;;  %v596_v38 = vsel %vm280_vm3, %v1403_v49, %v595_v36  ;;  %v668_v34 = vrot.slane %v1384_v0, 4  ;;  %v670_v35 = vrot.slane %v1389_v2, 3 }
  0x4d   : > { %v672_v25 = vrot.slane %v1398_v4, 2  ;;  %v549_v29 = vadd.f32 %v541_v32, %v471_v10  ;;  %v551_v39 = vadd.f32 %v543_v7, %v473_v12  ;;  %v598_v22 = vsel %vm283_vm4, %v597_v56, %v596_v38  ;;  %v1571_v12 = vld [vmem:[%s1199_s28 + $0x28] sm:$0x7f] }
  0x4e   : > { %v674_v26 = vrot.slane %v1403_v49, 1  ;;  %v600_v16 = vsel %vm286_vm5, %v599_v15, %v598_v22  ;;  %v669_v44 = vsel %vm271_vm0, %v668_v34, %v667_v37  ;;  %v677_v46 = vrot.slane %v1415_v5, 7 }
  0x4f   : > { %v679_v50 = vrot.slane %v1425_v59, 6  ;;  %v1559_v51 = vsel %vm289_vm6, %v601_v20, %v600_v16  ;;  %v671_v58 = vsel %vm274_vm1, %v670_v35, %v669_v44  ;;  %v716_v60 = vrot.slane %v1370_v42, %v1354_v27 }
  0x50   : > { %v724_v61 = vrot.slane %v1373_v11, %v1354_v27  ;;  %v619_v63 = vmul.f32 %v1559_v51, %v560_v47  ;;  %v621_v53 = vmul.f32 %v1559_v51, %v568_v3  ;;  %v673_v54 = vsel %vm277_vm2, %v672_v25, %v671_v58 }
  0x51   : > { %v745_v10 = vrot.slane %v1432_v62, 6  ;;  %v675_v13 = vsel %vm280_vm3, %v674_v26, %v673_v54  ;;  %v746_v56 = vrot.slane %v1384_v0, 5  ;;  %v748_v8 = vrot.slane %v1389_v2, 4 }
  0x52   : > { %v750_v42 = vrot.slane %v1398_v4, 3  ;;  %v627_v11 = vadd.f32 %v619_v63, %v549_v29  ;;  %v629_v47 = vadd.f32 %v621_v53, %v551_v39  ;;  %v676_v3 = vsel %vm283_vm4, %v1410_v52, %v675_v13 }
  0x53   : > { %v752_v15 = vrot.slane %v1403_v49, 2  ;;  %v678_v62 = vsel %vm286_vm5, %v677_v46, %v676_v3  ;;  %v747_v20 = vsel %vm271_vm0, %v746_v56, %v745_v10  ;;  %v754_v28 = vrot.slane %v1410_v52, 1  ;;  %v218_v3 = vld [vmem:[%s1199_s28 + $0x20] sm:$0x7f] }
  0x54   : > { %v757_v0 = vrot.slane %v1425_v59, 7  ;;  %v1588_v2 = vsel %vm289_vm6, %v679_v50, %v678_v62  ;;  %v749_v4 = vsel %vm274_vm1, %v748_v8, %v747_v20  ;;  %v245_v32 = vrot.slane %v1571_v12, %v1193_v9 }
  0x55   : > { %v253_v7 = vrot.slane %v1578_v14, %v1193_v9  ;;  %v697_v49 = vmul.f32 %v1588_v2, %v638_v30  ;;  %v699_v36 = vmul.f32 %v1588_v2, %v646_v31  ;;  %v751_v37 = vsel %vm277_vm2, %v750_v42, %v749_v4 }
  0x56   : > { %v346_v52 = vrot.slane %v1571_v12, %v1226_v24  ;;  %v753_v59 = vsel %vm280_vm3, %v752_v15, %v751_v37  ;;  %v312_v38 = vmul.f32 %v1250_v41, %v245_v32  ;;  %v354_v35 = vrot.slane %v1578_v14, %v1226_v24 }
  0x57   : > { %v314_v34 = vmul.f32 %v1250_v41, %v253_v7  ;;  %v705_v25 = vadd.f32 %v697_v49, %v627_v11  ;;  %v707_v29 = vadd.f32 %v699_v36, %v629_v47  ;;  %v755_v30 = vsel %vm283_vm4, %v754_v28, %v753_v59 }
  0x58   : > { %v390_v31 = vmul.f32 %v1271_v57, %v346_v52  ;;  %v756_v39 = vsel %vm286_vm5, %v1415_v5, %v755_v30  ;;  %v392_v22 = vmul.f32 %v1271_v57, %v354_v35  ;;  %v424_v26 = vrot.slane %v1571_v12, %v1247_v40 }
  0x59   : > { %v432_v41 = vrot.slane %v1578_v14, %v1247_v40  ;;  %v1615_v16 = vsel %vm289_vm6, %v757_v0, %v756_v39  ;;  %v502_v46 = vrot.slane %v1571_v12, %v1280_v1  ;;  %v510_v50 = vrot.slane %v1578_v14, %v1280_v1 }
  0x5a   : > { %v398_v44 = vadd.f32 %v390_v31, %v312_v38  ;;  %v775_v5 = vmul.f32 %v1615_v16, %v716_v60  ;;  %v777_v57 = vmul.f32 %v1615_v16, %v724_v61  ;;  %v400_v58 = vadd.f32 %v392_v22, %v314_v34 }
  0x5b   : > { %v468_v63 = vmul.f32 %v1290_v21, %v424_v26  ;;  %v470_v53 = vmul.f32 %v1290_v21, %v432_v41  ;;  %v546_v54 = vmul.f32 %v1320_v48, %v502_v46  ;;  %v548_v10 = vmul.f32 %v1320_v48, %v510_v50  ;;  %v220_v48 = vld [vmem:[%s1199_s28 + $0x30] sm:$0x7f] }
  0x5c   : > { %v580_v13 = vrot.slane %v1571_v12, %v1305_v33  ;;  %v783_v56 = vadd.f32 %v775_v5, %v705_v25  ;;  %v785_v8 = vadd.f32 %v777_v57, %v707_v29  ;;  %v588_v60 = vrot.slane %v1578_v14, %v1305_v33 }
  0x5d   : > { %v476_v42 = vadd.f32 %v468_v63, %v398_v44  ;;  %v478_v61 = vadd.f32 %v470_v53, %v400_v58  ;;  %v658_v47 = vrot.slane %v1571_v12, %v1329_v55  ;;  %v666_v21 = vrot.slane %v1578_v14, %v1329_v55 }
  0x5e   : > { %v624_v11 = vmul.f32 %v1349_v23, %v580_v13  ;;  %v965_v15 = vpack.c.bf16 %v785_v8, %v783_v56  ;;  %v626_v20 = vmul.f32 %v1349_v23, %v588_v60  ;;  %v736_v28 = vrot.slane %v1571_v12, %v1354_v27  ;;  %v213_v8 = vld [vmem:[%s1731_s3] sm:$0xff] }
  0x5f   : > { %v554_v62 = vadd.f32 %v546_v54, %v476_v42  ;;  %v556_v0 = vadd.f32 %v548_v10, %v478_v61  ;;  %v702_v4 = vmul.f32 %v1376_v43, %v658_v47  ;;  %v704_v32 = vmul.f32 %v1376_v43, %v666_v21 }
  0x60   : > { %v744_v7 = vrot.slane %v1578_v14, %v1354_v27  ;;  %966 = vmatpush1.bf16.msra.mxu0 %v965_v15  ;;  %v780_v36 = vmul.f32 %v1444_v19, %v736_v28  ;;  %v241_v37 = vrot.slane %v218_v3, %v1193_v9  ;;  %v249_v52 = vrot.slane %v220_v48, %v1193_v9 }
  0x61   : > { %v632_v49 = vadd.f32 %v624_v11, %v554_v62  ;;  %v634_v23 = vadd.f32 %v626_v20, %v556_v0  ;;  %v342_v12 = vrot.slane %v218_v3, %v1226_v24  ;;  %v350_v38 = vrot.slane %v220_v48, %v1226_v24 }
  0x62   : > { %v782_v59 = vmul.f32 %v1444_v19, %v744_v7  ;;  %v311_v43 = vmul.f32 %v1467_v45, %v241_v37  ;;  %v313_v14 = vmul.f32 %v1467_v45, %v249_v52  ;;  %v420_v35 = vrot.slane %v218_v3, %v1247_v40 }
  0x63   : > { %v710_v34 = vadd.f32 %v702_v4, %v632_v49  ;;  %v712_v25 = vadd.f32 %v704_v32, %v634_v23  ;;  %v389_v29 = vmul.f32 %v1490_v18, %v342_v12  ;;  %v391_v30 = vmul.f32 %v1490_v18, %v350_v38 }
  0x64   : > { %v428_v9 = vrot.slane %v220_v48, %v1247_v40  ;;  %v467_v19 = vmul.f32 %v1513_v17, %v420_v35  ;;  %v498_v39 = vrot.slane %v218_v3, %v1280_v1  ;;  %v506_v24 = vrot.slane %v220_v48, %v1280_v1 }
  0x65   : > { %v788_v31 = vadd.f32 %v780_v36, %v710_v34  ;;  %v790_v22 = vadd.f32 %v782_v59, %v712_v25  ;;  %v397_v26 = vadd.f32 %v389_v29, %v311_v43  ;;  %v399_v41 = vadd.f32 %v391_v30, %v313_v14 }
  0x66   : > { %v469_v45 = vmul.f32 %v1513_v17, %v428_v9  ;;  %v545_v44 = vmul.f32 %v1536_v6, %v498_v39  ;;  %v547_v46 = vmul.f32 %v1536_v6, %v506_v24  ;;  %v576_v18 = vrot.slane %v218_v3, %v1305_v33 }
  0x67   : > { %v584_v40 = vrot.slane %v220_v48, %v1305_v33  ;;  %v967_v50 = vpack.c.bf16 %v790_v22, %v788_v31  ;;  %v475_v5 = vadd.f32 %v467_v19, %v397_v26  ;;  %v654_v58 = vrot.slane %v218_v3, %v1329_v55 }
  0x68   : > { %v477_v57 = vadd.f32 %v469_v45, %v399_v41  ;;  %v623_v1 = vmul.f32 %v1559_v51, %v576_v18  ;;  %v662_v53 = vrot.slane %v220_v48, %v1329_v55  ;;  %v732_v17 = vrot.slane %v218_v3, %v1354_v27  ;;  %v212_v3 = vld [vmem:[%s1730_s2] sm:$0xff] }
  0x69   : > { %v625_v63 = vmul.f32 %v1559_v51, %v584_v40  ;;  %968 = vmatprep.subr.bf16.mxu0 %v967_v50  ;;  %v553_v54 = vadd.f32 %v545_v44, %v475_v5  ;;  %v701_v10 = vmul.f32 %v1588_v2, %v654_v58  ;;  %v740_v33 = vrot.slane %v220_v48, %v1354_v27 }
  0x6a   : > { %v555_v6 = vadd.f32 %v547_v46, %v477_v57  ;;  %v703_v13 = vmul.f32 %v1588_v2, %v662_v53  ;;  %v779_v56 = vmul.f32 %v1615_v16, %v732_v17  ;;  %v1077_v60 = vmov 0.0  }
  0x6b   : > { %v631_v51 = vadd.f32 %v623_v1, %v553_v54  ;;  %v781_v55 = vmul.f32 %v1615_v16, %v740_v33  ;;  %864 = vmatprep.mubr.f32.mxu0 %v1077_v60  ;;  %v1078_v61 = vmov 0   ;;  %vm796_vm7 = vcmask 261120  }
  0x6c   : > { %v633_v42 = vadd.f32 %v625_v63, %v555_v6  ;;  %1012 = vset.pattern.permute.xlu0 %v1078_v61  ;;  %vm872_vm8 = vcmask 277504  }
  0x6d   : > { %v709_v11 = vadd.f32 %v701_v10, %v631_v51  ;;  %793 = vperm.xlu0 %1012, %v213_v8  }
  0x6e   : > { %v711_v27 = vadd.f32 %v703_v13, %v633_v42 }
  0x6f   : > { %v787_v2 = vadd.f32 %v779_v56, %v709_v11 }
  0x70   : > { %v789_v47 = vadd.f32 %v781_v55, %v711_v27 }
  0x72   : > { %v969_v21 = vpack.c.bf16 %v789_v47, %v787_v2 }
  0x74   : > { %970 = vmatpush1.bf16.msra.mxu0 %v969_v21 }
  0x77   : > { %955 = vmatmul.mubr.msk.f32.vlgmr.msra.gmra.mrb[0].mxu0 %vm796_vm7, %v212_v3 }
  0xec   : > { %v794_v16 = vpop.permute.xlu0 %793 }
 0x14a   : > { %v866_v48 = vpop.f32.mrb[0].mxu0 }
 0x14b   : > { %v867_v15 = vadd.f32 %v866_v48, %v794_v16  ;;  %v868_v62 = vpop.f32.mrb[1].mxu0 }
 0x14c   : > { %v869_v20 = vadd.f32 %v868_v62, %v794_v16 }
 0x14d   : > { %871 = vst [vmem:[%s190_s11] sm:$0xff] %v867_v15 }
 0x14e   : > { %873 = vst.msk [vmem:[%s190_s11 + $0x8] sm:$0xff] %vm872_vm8, %v869_v20 }
 0x14f   : > { %1026 = shalt.err (!%p1023_p3)
}
 0x150   : > { %s1027_s30 = scalar_lea.hbm %s1686_s20, 256  ;;  %s1031_s6 = scalar_lea.hbm %s1732_s4, 512 }
 0x151   : > { %p1028_p4 = scmp.ne.s32.totalorder %s1686_s20, %s1027_s30  ;;  %p1032_p9 = scmp.lt.u32.totalorder %s1686_s20, %s1732_s4 }
 0x152   : > { %p1033_p10 = scmp.lt.u32.totalorder %s1031_s6, %s1027_s30  ;;  %p1035_p12 = scmp.lt.u32.totalorder %s1027_s30, %s1686_s20 }
 0x153   : > { %p1029_p7 = pnand %p1028_p4, %p1143_p5 }
 0x154   : > { %p1034_p11 = por %p1033_p10, %p1032_p9 }
 0x155   : > { %p1030_p8 = pneg %p1029_p7 }
 0x156   : > { %p1036_p13 = por %p1035_p12, %p1034_p11 }
 0x158   : > { %p1037_p0 = pnand %p1036_p13, %p1030_p8 }
 0x15a   : > { %1040 = shalt.err (!%p1037_p0)
}
 0x15b   : > { %971 = dma.vmem_to_hbm [thread:$0]  (%p1143_p5), %s1688_s12, 256, %s1686_s20, %s875_s19  }
 0x15c PF: > { %p977_p1 = scmp.ge.s32.totalorder %s1075_s18, 2  ;;  %s901_s9 = sand.u32 1, %s1063_s15  }
 0x15d   : > { %s902_s10 = scalar_lea.sflag [#allocation3], %s901_s9 }
 0x15e   : > { %p974_p2 = pnand %p977_p1, %p1147_p6 }
 0x160   : > { %1058 = dma.done.wait (!%p974_p2), %s902_s10, 256  }
 0x161   : > { %1060 = vsyncadd (!%p974_p2), %s902_s10, 4294967040  ;;  %p14_p3 = scmp.ge.s32.totalorder %s1130_s21, 4   ;;  %s1735_s15 = smov %s1067_s16 }
 0x162   : > { %s1736_s16 = smov %s1071_s17  ;;  %s1737_s17 = smov %s1141_s24 }
 0x163   : > { %s1738_s18 = smov %s1130_s21  ;;  %16 = sbr.rel (!%p14_p3) target bundleno = 3 (0x3), region = 71 }
 0x16a   :  { %907 = vsyncpa [#allocation3], 1 }
 0x16b   :  { %909 = vsyncpa [#allocation3 + $0x1], 1 }

</bundles_post_ra>
